<compile_context>
chip_gen: v6e
topology: v6e:2x2x1
jax: 0.10.0
libtpu: 0.0.40
codegen_flags: <defaults>
</compile_context>

<pallas_src>
import functools

import jax
import jax.numpy as jnp
from jax.experimental import pallas as pl
from jax.experimental.pallas import tpu as pltpu

_LANE = 128      # lane width (last dim granule)
_SUBLANE = 8     # sublane granule (second-to-last dim)


def _round_up(n, m):
    return pl.cdiv(n, m) * m


def _four_layer_fc_kernel(x_ref, w1_ref, w2_ref, w3_ref, w4_ref, o_ref, *, num_classes):
    # x tile: [TB, IN_pad] bf16; weights: bf16, padded to lane/MXU granules.
    x = x_ref[...]

    h = jnp.dot(x, w1_ref[...], preferred_element_type=jnp.float32)
    h = jnp.maximum(h, 0.0)

    h = jnp.dot(h.astype(w2_ref.dtype), w2_ref[...], preferred_element_type=jnp.float32)
    h = jnp.maximum(h, 0.0)

    h = jnp.dot(h.astype(w3_ref.dtype), w3_ref[...], preferred_element_type=jnp.float32)
    h = jnp.maximum(h, 0.0)

    logits = jnp.dot(h.astype(w4_ref.dtype), w4_ref[...],
                     preferred_element_type=jnp.float32)  # [TB, C_pad] f32

    # Padded class lanes must not perturb the log-sum-exp: mask to a large negative.
    lane = jax.lax.broadcasted_iota(jnp.int32, logits.shape, dimension=1)
    logits = jnp.where(lane < num_classes, logits, jnp.float32(-1e30))

    # Numerically-stable log_softmax over the class axis, in f32.
    m = jnp.max(logits, axis=-1, keepdims=True)
    shifted = logits - m
    lse = jnp.log(jnp.sum(jnp.exp(shifted), axis=-1, keepdims=True))
    o_ref[...] = (shifted - lse).astype(o_ref.dtype)


def four_layer_fc(x, w1, w2, w3, w4, *, compute_dtype=jnp.bfloat16, max_batch_tile=512):
    """x: [B, ...] (flattened inside). w_i: [in_i, out_i] (transpose of PyTorch's [out, in]).
    Returns [B, num_classes] float32 log-probs."""
    B = x.shape[0]
    x2d = x.reshape(B, -1)
    input_size = x2d.shape[1]
    hidden = w1.shape[1]
    num_classes = w4.shape[1]

    # Padded (lane / sublane aligned) problem sizes.
    in_pad = _round_up(input_size, _LANE)
    h_pad = _round_up(hidden, _LANE)
    c_pad = _round_up(num_classes, _LANE)

    # Batch tile: multiple of 8 sublanes; large tiles amortize per-step overhead.
    tb = min(max_batch_tile, _round_up(B, _SUBLANE))
    b_pad = _round_up(B, tb)
    grid = (b_pad // tb,)

    # Zero-pad + cast to bf16 (zero pads are exact through ReLU / matmul).
    x_p = jnp.zeros((b_pad, in_pad), compute_dtype)
    x_p = x_p.at[:B, :input_size].set(x2d.astype(compute_dtype))
    w1_p = jnp.zeros((in_pad, h_pad), compute_dtype).at[:input_size, :hidden].set(
        w1.astype(compute_dtype))
    w2_p = jnp.zeros((h_pad, h_pad), compute_dtype).at[:hidden, :hidden].set(
        w2.astype(compute_dtype))
    w3_p = jnp.zeros((h_pad, h_pad), compute_dtype).at[:hidden, :hidden].set(
        w3.astype(compute_dtype))
    w4_p = jnp.zeros((h_pad, c_pad), compute_dtype).at[:hidden, :num_classes].set(
        w4.astype(compute_dtype))

    # VMEM budget: double-buffered x / out tiles + resident weights + activation slack.
    itemsize = jnp.dtype(compute_dtype).itemsize
    vmem_need = 2 * tb * in_pad * itemsize                      # x tile (double-buffered)
    vmem_need += 2 * sum(w.size * itemsize for w in (w1_p, w2_p, w3_p, w4_p))
    vmem_need += 2 * tb * c_pad * 4                             # f32 output tile
    vmem_need += 6 * tb * max(h_pad, c_pad) * 4                 # f32 activation working set
    vmem_limit = int(min(max(2 * vmem_need, 16 * 1024 * 1024), 56 * 1024 * 1024))

    flops = 2 * b_pad * (in_pad * h_pad + 2 * h_pad * h_pad + h_pad * c_pad)
    bytes_accessed = (x_p.size + w1_p.size + w2_p.size + w3_p.size + w4_p.size) * itemsize \
        + b_pad * c_pad * 4
    cost = pl.CostEstimate(flops=flops,
                           transcendentals=b_pad * (c_pad + 1),
                           bytes_accessed=bytes_accessed)

    kernel = functools.partial(_four_layer_fc_kernel, num_classes=num_classes)

    out_padded = pl.pallas_call(
        kernel,
        out_shape=jax.ShapeDtypeStruct((b_pad, c_pad), jnp.float32),
        grid_spec=pltpu.PrefetchScalarGridSpec(
            num_scalar_prefetch=0,
            grid=grid,
            in_specs=[
                pl.BlockSpec((tb, in_pad), lambda i: (i, 0)),     # x: tiled over batch
                pl.BlockSpec((in_pad, h_pad), lambda i: (0, 0)),  # weights: VMEM-resident
                pl.BlockSpec((h_pad, h_pad), lambda i: (0, 0)),
                pl.BlockSpec((h_pad, h_pad), lambda i: (0, 0)),
                pl.BlockSpec((h_pad, c_pad), lambda i: (0, 0)),
            ],
            out_specs=pl.BlockSpec((tb, c_pad), lambda i: (i, 0)),
        ),
        compiler_params=pltpu.CompilerParams(
            dimension_semantics=("parallel",),   # batch tiles are independent (v7x 2 TCs)
            vmem_limit_bytes=vmem_limit,
        ),
        cost_estimate=cost,
    )(x_p, w1_p, w2_p, w3_p, w4_p)

    return out_padded[:B, :num_classes]


def init_params(key, input_size, hidden_size, num_classes):
    """Deterministic synthetic init (Kaiming-uniform-like scaling), stored as [in, out]."""
    k1, k2, k3, k4 = jax.random.split(key, 4)

    def lin(k, fan_in, fan_out):
        bound = 1.0 / jnp.sqrt(fan_in)
        return jax.random.uniform(
            k, (fan_in, fan_out), dtype=jnp.float32, minval=-bound, maxval=bound
        )

    w1 = lin(k1, input_size, hidden_size)
    w2 = lin(k2, hidden_size, hidden_size)
    w3 = lin(k3, hidden_size, hidden_size)
    w4 = lin(k4, hidden_size, num_classes)
    return w1, w2, w3, w4


def reference_forward(x, w1, w2, w3, w4, compute_dtype=jnp.bfloat16):
    """Pure-JAX reference mirroring the kernel's bf16-inputs / f32-accumulate dataflow."""
    h = x.reshape(x.shape[0], -1).astype(compute_dtype)
    h = jnp.maximum(jnp.dot(h, w1.astype(compute_dtype),
                            preferred_element_type=jnp.float32), 0.0)
    h = jnp.maximum(jnp.dot(h.astype(compute_dtype), w2.astype(compute_dtype),
                            preferred_element_type=jnp.float32), 0.0)
    h = jnp.maximum(jnp.dot(h.astype(compute_dtype), w3.astype(compute_dtype),
                            preferred_element_type=jnp.float32), 0.0)
    logits = jnp.dot(h.astype(compute_dtype), w4.astype(compute_dtype),
                     preferred_element_type=jnp.float32)
    return jax.nn.log_softmax(logits, axis=1)


if __name__ == "__main__":
    key = jax.random.PRNGKey(0)
    k_x, k_p = jax.random.split(key)

    # Small shapes consistent with the module: input gets flattened, so use
    # x: [batch=2, 4, 16, 16] -> input_size = 4*16*16 = 1024, hidden=32, classes=10.
    B, C, H, W = 2, 4, 16, 16
    input_size = C * H * W
    hidden_size = 32
    num_classes = 10

    x = jax.random.normal(k_x, (B, C, H, W), dtype=jnp.float32)
    w1, w2, w3, w4 = init_params(k_p, input_size, hidden_size, num_classes)

    out = four_layer_fc(x, w1, w2, w3, w4)
    out = jax.block_until_ready(out)

    ref = reference_forward(x, w1, w2, w3, w4)
    assert out.shape == (B, num_classes)
    assert bool(jnp.all(jnp.isfinite(out))), "non-finite output"
    assert jnp.allclose(out, ref, atol=1e-3, rtol=1e-3), "mismatch vs reference"

    print("KERNEL_OK")
</pallas_src>

<mosaic_0001>
module attributes {stable_mosaic.version = 11 : i64} {
  func.func @_four_layer_fc_kernel(%arg0: i32, %arg1: memref<8x1024xbf16, #tpu.memory_space<vmem>>, %arg2: memref<1024x128xbf16, #tpu.memory_space<vmem>>, %arg3: memref<128x128xbf16, #tpu.memory_space<vmem>>, %arg4: memref<128x128xbf16, #tpu.memory_space<vmem>>, %arg5: memref<128x128xbf16, #tpu.memory_space<vmem>>, %arg6: memref<8x128xf32, #tpu.memory_space<vmem>>) attributes {dimension_semantics = [#tpu.dimension_semantics<parallel>], iteration_bounds = array<i64: 1>, scalar_prefetch = 0 : i64, scratch_operands = 0 : i64, tpu.core_type = #tpu.core_type<tc>, window_params = [{transform_indices = @transform_0, window_bounds = array<i64: 8, 1024>}, {pipeline_mode = #tpu.pipeline_mode<synchronous>, transform_indices = @transform_1, window_bounds = array<i64: 1024, 128>}, {pipeline_mode = #tpu.pipeline_mode<synchronous>, transform_indices = @transform_2, window_bounds = array<i64: 128, 128>}, {pipeline_mode = #tpu.pipeline_mode<synchronous>, transform_indices = @transform_3, window_bounds = array<i64: 128, 128>}, {pipeline_mode = #tpu.pipeline_mode<synchronous>, transform_indices = @transform_4, window_bounds = array<i64: 128, 128>}, {transform_indices = @transform_5, window_bounds = array<i64: 8, 128>}]} {
    %c0 = arith.constant 0 : index
    %c0_0 = arith.constant 0 : index
    %0 = vector.load %arg1[%c0, %c0_0] : memref<8x1024xbf16, #tpu.memory_space<vmem>>, vector<8x1024xbf16>
    %c0_1 = arith.constant 0 : index
    %c0_2 = arith.constant 0 : index
    %1 = vector.load %arg2[%c0_1, %c0_2] : memref<1024x128xbf16, #tpu.memory_space<vmem>>, vector<1024x128xbf16>
    %cst = arith.constant dense<0.000000e+00> : vector<8x128xf32>
    %2 = tpu.matmul %0, %1, %cst {dimension_numbers = #tpu.dot_dimension_numbers<[1], [0], [0], [1], [0, 0, 1, 1], [], []>} : vector<8x1024xbf16>, vector<1024x128xbf16>, vector<8x128xf32> -> vector<8x128xf32>
    %cst_3 = arith.constant 0.000000e+00 : f32
    %3 = vector.broadcast %cst_3 : f32 to vector<8x128xf32>
    %4 = arith.maximumf %2, %3 : vector<8x128xf32>
    %5 = arith.truncf %4 : vector<8x128xf32> to vector<8x128xbf16>
    %c0_4 = arith.constant 0 : index
    %c0_5 = arith.constant 0 : index
    %6 = vector.load %arg3[%c0_4, %c0_5] : memref<128x128xbf16, #tpu.memory_space<vmem>>, vector<128x128xbf16>
    %cst_6 = arith.constant dense<0.000000e+00> : vector<8x128xf32>
    %7 = tpu.matmul %5, %6, %cst_6 {dimension_numbers = #tpu.dot_dimension_numbers<[1], [0], [0], [1], [0, 0, 1, 1], [], []>} : vector<8x128xbf16>, vector<128x128xbf16>, vector<8x128xf32> -> vector<8x128xf32>
    %cst_7 = arith.constant 0.000000e+00 : f32
    %8 = vector.broadcast %cst_7 : f32 to vector<8x128xf32>
    %9 = arith.maximumf %7, %8 : vector<8x128xf32>
    %10 = arith.truncf %9 : vector<8x128xf32> to vector<8x128xbf16>
    %c0_8 = arith.constant 0 : index
    %c0_9 = arith.constant 0 : index
    %11 = vector.load %arg4[%c0_8, %c0_9] : memref<128x128xbf16, #tpu.memory_space<vmem>>, vector<128x128xbf16>
    %cst_10 = arith.constant dense<0.000000e+00> : vector<8x128xf32>
    %12 = tpu.matmul %10, %11, %cst_10 {dimension_numbers = #tpu.dot_dimension_numbers<[1], [0], [0], [1], [0, 0, 1, 1], [], []>} : vector<8x128xbf16>, vector<128x128xbf16>, vector<8x128xf32> -> vector<8x128xf32>
    %cst_11 = arith.constant 0.000000e+00 : f32
    %13 = vector.broadcast %cst_11 : f32 to vector<8x128xf32>
    %14 = arith.maximumf %12, %13 : vector<8x128xf32>
    %15 = arith.truncf %14 : vector<8x128xf32> to vector<8x128xbf16>
    %c0_12 = arith.constant 0 : index
    %c0_13 = arith.constant 0 : index
    %16 = vector.load %arg5[%c0_12, %c0_13] : memref<128x128xbf16, #tpu.memory_space<vmem>>, vector<128x128xbf16>
    %cst_14 = arith.constant dense<0.000000e+00> : vector<8x128xf32>
    %17 = tpu.matmul %15, %16, %cst_14 {dimension_numbers = #tpu.dot_dimension_numbers<[1], [0], [0], [1], [0, 0, 1, 1], [], []>} : vector<8x128xbf16>, vector<128x128xbf16>, vector<8x128xf32> -> vector<8x128xf32>
    %18 = tpu.iota {dimensions = array<i32: 1>} : vector<8x128xi32>
    %c10_i32 = arith.constant 10 : i32
    %19 = vector.broadcast %c10_i32 : i32 to vector<8x128xi32>
    %20 = arith.cmpi slt, %18, %19 : vector<8x128xi32>
    %cst_15 = arith.constant -1.000000e+30 : f32
    %21 = vector.broadcast %cst_15 : f32 to vector<8x128xf32>
    %22 = arith.select %20, %17, %21 : vector<8x128xi1>, vector<8x128xf32>
    %cst_16 = arith.constant dense<0xFF800000> : vector<8xf32>
    %23 = vector.multi_reduction <maximumf>, %22, %cst_16 [1] : vector<8x128xf32> to vector<8xf32>
    %24 = vector.shape_cast %23 : vector<8xf32> to vector<8x1xf32>
    %25 = vector.broadcast %24 : vector<8x1xf32> to vector<8x128xf32>
    %26 = arith.subf %22, %25 : vector<8x128xf32>
    %27 = math.exp %26 : vector<8x128xf32>
    %cst_17 = arith.constant dense<0.000000e+00> : vector<8xf32>
    %28 = vector.multi_reduction <add>, %27, %cst_17 [1] : vector<8x128xf32> to vector<8xf32>
    %29 = vector.shape_cast %28 : vector<8xf32> to vector<8x1xf32>
    %30 = math.log %29 : vector<8x1xf32>
    %31 = vector.broadcast %30 : vector<8x1xf32> to vector<8x128xf32>
    %32 = arith.subf %26, %31 : vector<8x128xf32>
    %c0_18 = arith.constant 0 : index
    %c0_19 = arith.constant 0 : index
    %33 = vector.load %arg6[%c0_18, %c0_19] : memref<8x128xf32, #tpu.memory_space<vmem>>, vector<8x128xf32>
    tpu.vector_store %arg6[%c0_18, %c0_19], %32 {strides = array<i32>} : memref<8x128xf32, #tpu.memory_space<vmem>>, vector<8x128xf32>,
    return
  }
  func.func @transform_0(%arg0: i32) -> (i32, i32) {
    %c0_i32 = arith.constant 0 : i32
    %c0_i32_0 = arith.constant 0 : i32
    return %arg0, %c0_i32 : i32, i32
  }
  func.func @transform_1(%arg0: i32) -> (i32, i32) {
    %c0_i32 = arith.constant 0 : i32
    %c0_i32_0 = arith.constant 0 : i32
    %c0_i32_1 = arith.constant 0 : i32
    return %c0_i32, %c0_i32_0 : i32, i32
  }
  func.func @transform_2(%arg0: i32) -> (i32, i32) {
    %c0_i32 = arith.constant 0 : i32
    %c0_i32_0 = arith.constant 0 : i32
    %c0_i32_1 = arith.constant 0 : i32
    return %c0_i32, %c0_i32_0 : i32, i32
  }
  func.func @transform_3(%arg0: i32) -> (i32, i32) {
    %c0_i32 = arith.constant 0 : i32
    %c0_i32_0 = arith.constant 0 : i32
    %c0_i32_1 = arith.constant 0 : i32
    return %c0_i32, %c0_i32_0 : i32, i32
  }
  func.func @transform_4(%arg0: i32) -> (i32, i32) {
    %c0_i32 = arith.constant 0 : i32
    %c0_i32_0 = arith.constant 0 : i32
    %c0_i32_1 = arith.constant 0 : i32
    return %c0_i32, %c0_i32_0 : i32, i32
  }
  func.func @transform_5(%arg0: i32) -> (i32, i32) {
    %c0_i32 = arith.constant 0 : i32
    %c0_i32_0 = arith.constant 0 : i32
    return %arg0, %c0_i32 : i32, i32
  }
}

</mosaic_0001>

<bundles_post_ra>
// kernel: tpu_custom_call.1
= control target key start
LH: loop header
LB: loop body
LE: loop exit
PB: predicated region body
PF: predicated region fallthrough
CT: control target
= control target key end

     0   :  { %10 = vsyncpa [#allocation3], 0  ;;  %s1751_s0 = inlined_call_operand.hbm [shape: bf16[8,1024], index: 0, kind: input, shape index: {}]   ;;  %s1752_s1 = inlined_call_operand.hbm [shape: bf16[1024,128], index: 1, kind: input, shape index: {}]   ;;  %s1753_s2 = inlined_call_operand.hbm [shape: bf16[128,128], index: 2, kind: input, shape index: {}]   ;;  %s1754_s3 = inlined_call_operand.hbm [shape: bf16[128,128], index: 3, kind: input, shape index: {}]   ;;  %s1755_s4 = inlined_call_operand.hbm [shape: bf16[128,128], index: 4, kind: input, shape index: {}]   ;;  %s1756_s5 = inlined_call_operand.hbm [shape: f32[8,128], index: 5, kind: output, shape index: {}]  }
   0x1   :  { %11 = vsyncpa [#allocation6], 0 }
   0x2   :  { %12 = vsyncpa [#allocation9], 0 }
   0x3   :  { %13 = vsyncpa [#allocation4], 0  ;;  %s1651_s18 = smov [#allocation5]  }
   0x4   :  { %s29_s19 = sshll.u32 %s1651_s18, 4  ;;  %s30_s19 = int_to_ptr.vmem [resolvable:$true] %s29_s19 }
   0x5   :  { %s1531_s20 = scalar_lea.vmem %s30_s19, 8192  ;;  %p1536_p1 = scmp.lt.s32.totalorder %s30_s19, %s30_s19 }
   0x6   :  { %p1532_p0 = scmp.ne.s32.totalorder %s30_s19, %s1531_s20  ;;  %p1537_p2 = scmp.lt.s32.totalorder %s1531_s20, %s1531_s20 }
   0x8   :  { %p1538_p3 = por %p1537_p2, %p1536_p1 }
   0xa   :  { %p1539_p4 = pnand %p1538_p3, %p1532_p0 }
   0xc   :  { %1542 = shalt.err (!%p1539_p4)
}
   0xd   :  { %s1652_s21 = smov 64   ;;  %s1653_s22 = smov 4  }
   0xe   :  { %35 = dma.hbm_to_vmem [thread:$0]  %s1752_s1, 8192, %s30_s19, [#allocation6], %s1652_s21, %s1652_s21, %s1653_s22  }
   0xf   :  { %s1654_s25 = smov [#allocation8]   ;;  %s1655_s27 = smov [#allocation2]  }
  0x10   :  { %s53_s26 = sshll.u32 %s1654_s25, 4  ;;  %s20_s28 = sshll.u32 %s1655_s27, 4  ;;  %s54_s26 = int_to_ptr.vmem [resolvable:$true] %s53_s26  ;;  %s21_s28 = int_to_ptr.vmem [resolvable:$true] %s20_s28 }
  0x11   :  { %s1551_s29 = scalar_lea.vmem %s54_s26, 1024  ;;  %p1556_p6 = scmp.lt.s32.totalorder %s54_s26, %s54_s26 }
  0x12   :  { %p1552_p5 = scmp.ne.s32.totalorder %s54_s26, %s1551_s29  ;;  %p1557_p7 = scmp.lt.s32.totalorder %s1551_s29, %s1551_s29 }
  0x14   :  { %p1558_p8 = por %p1557_p7, %p1556_p6 }
  0x16   :  { %p1559_p9 = pnand %p1558_p8, %p1552_p5 }
  0x18   :  { %1562 = shalt.err (!%p1559_p9)
}
  0x19   :  { %59 = dma.hbm_to_vmem [thread:$0]  %s1754_s3, 1024, %s54_s26, [#allocation9], %s1652_s21, %s1652_s21, %s1653_s22  }
  0x1a   :  { %s1571_s1 = scalar_lea.vmem %s21_s28, 512  ;;  %p1576_p11 = scmp.lt.s32.totalorder %s21_s28, %s21_s28 }
  0x1b   :  { %p1572_p10 = scmp.ne.s32.totalorder %s21_s28, %s1571_s1  ;;  %p1577_p12 = scmp.lt.s32.totalorder %s1571_s1, %s1571_s1 }
  0x1d   :  { %p1578_p13 = por %p1577_p12, %p1576_p11 }
  0x1f   :  { %p1579_p0 = pnand %p1578_p13, %p1572_p10 }
  0x21   :  { %1582 = shalt.err (!%p1579_p0)
}
  0x22   :  { %23 = dma.hbm_to_vmem [thread:$0]  %s1751_s0, 512, %s21_s28, [#allocation3]  }
  0x23   :  { %s1656_s9 = smov [#allocation7]   ;;  %s1657_s11 = smov [#allocation10]  }
  0x24   :  { %s41_s10 = sshll.u32 %s1656_s9, 4  ;;  %s65_s12 = sshll.u32 %s1657_s11, 4  ;;  %s42_s10 = int_to_ptr.vmem [resolvable:$true] %s41_s10  ;;  %s66_s12 = int_to_ptr.vmem [resolvable:$true] %s65_s12 }
  0x25   :  { %s1591_s13 = scalar_lea.vmem %s42_s10, 1024  ;;  %p1596_p2 = scmp.lt.s32.totalorder %s42_s10, %s42_s10 }
  0x26   :  { %p1592_p1 = scmp.ne.s32.totalorder %s42_s10, %s1591_s13  ;;  %p1597_p3 = scmp.lt.s32.totalorder %s1591_s13, %s1591_s13 }
  0x28   :  { %p1598_p4 = por %p1597_p3, %p1596_p2 }
  0x2a   :  { %p1599_p5 = pnand %p1598_p4, %p1592_p1 }
  0x2c   :  { %1602 = shalt.err (!%p1599_p5)
}
  0x2d   :  { %47 = dma.hbm_to_vmem [thread:$0]  %s1753_s2, 1024, %s42_s10, [#allocation6], %s1652_s21, %s1652_s21, %s1653_s22  }
  0x2e   :  { %s1611_s0 = scalar_lea.vmem %s66_s12, 1024  ;;  %p1616_p7 = scmp.lt.s32.totalorder %s66_s12, %s66_s12 }
  0x2f   :  { %p1612_p6 = scmp.ne.s32.totalorder %s66_s12, %s1611_s0  ;;  %p1617_p8 = scmp.lt.s32.totalorder %s1611_s0, %s1611_s0 }
  0x31   :  { %p1618_p9 = por %p1617_p8, %p1616_p7 }
  0x33   :  { %p1619_p10 = pnand %p1618_p9, %p1612_p6 }
  0x35   :  { %1622 = shalt.err (!%p1619_p10)
}
  0x36   :  { %71 = dma.hbm_to_vmem [thread:$0]  %s1755_s4, 1024, %s66_s12, [#allocation9], %s1652_s21, %s1652_s21, %s1653_s22  }
  0x37   :  { %1643 = dma.done.wait [#allocation3], 512  }
  0x38   :  { %1644 = vsyncadd [#allocation3], 4294966784 }
  0x39   :  { %1645 = dma.done.wait [#allocation6], 9216  }
  0x3a   :  { %1646 = vsyncadd [#allocation6], 4294958080 }
  0x3b   :  { %1647 = dma.done.wait [#allocation9], 2048  }
  0x3c   :  { %1648 = vsyncadd [#allocation9], 4294965248  ;;  %v1423_v0 = vld [vmem:[#allocation5 + $0x78] sm:$0xff]   ;;  %v1427_v4 = vld [vmem:[#allocation5 + $0x70] sm:$0xff]   ;;  %vm1659_vm0 = vmmov 0   ;;  %s1660_s2 = smov [#allocation11]  }
  0x3d   :  { %v1424_v1 = vld [vmem:[#allocation5 + $0xf8] sm:$0xff]   ;;  %1238 = vmatprep.subr.bf16.mxu0 %v1423_v0  ;;  %v1428_v5 = vld [vmem:[#allocation5 + $0xf0] sm:$0xff]   ;;  %v1431_v8 = vld [vmem:[#allocation5 + $0x68] sm:$0xff]   ;;  %s1131_s4 = sshll.u32 %s1660_s2, 4  ;;  %s1132_s4 = int_to_ptr.vmem [resolvable:$true] %s1131_s4 }
  0x3e   :  { %v1425_v2 = vld [vmem:[#allocation5 + $0x38] sm:$0xff]   ;;  %1260 = vmatprep.subr.bf16.mxu1 %v1424_v1  ;;  %v1429_v6 = vld [vmem:[#allocation5 + $0x30] sm:$0xff]   ;;  %v1432_v9 = vld [vmem:[#allocation5 + $0xe8] sm:$0xff]   ;;  %s1623_s17 = scalar_lea.vmem %s1132_s4, 128  ;;  %p1628_p12 = scmp.lt.s32.totalorder %s1132_s4, %s1132_s4 }
  0x3f   :  { %v1426_v3 = vld [vmem:[#allocation5 + $0xb8] sm:$0xff]   ;;  %1239 = vmatpush3.bf16.msra.mxu0 %v1425_v2  ;;  %v1430_v7 = vld [vmem:[#allocation5 + $0xb0] sm:$0xff]   ;;  %v1433_v10 = vld [vmem:[#allocation5 + $0x28] sm:$0xff]   ;;  %p1624_p11 = scmp.ne.s32.totalorder %s1132_s4, %s1623_s17  ;;  %p1629_p13 = scmp.lt.s32.totalorder %s1623_s17, %s1623_s17 }
  0x40   :  { %1261 = vmatpush3.bf16.msra.mxu1 %v1426_v3  ;;  %1240 = vmatprep.subr.bf16.mxu0 %v1427_v4  ;;  %v1434_v11 = vld [vmem:[#allocation5 + $0xa8] sm:$0xff]   ;;  %v1435_v12 = vld [vmem:[#allocation5 + $0x60] sm:$0xff]   ;;  %v1439_v16 = vld [vmem:[#allocation5 + $0x58] sm:$0xff]  }
  0x41   :  { %1262 = vmatprep.subr.bf16.mxu1 %v1428_v5  ;;  %v1436_v13 = vld [vmem:[#allocation5 + $0xe0] sm:$0xff]   ;;  %v1440_v17 = vld [vmem:[#allocation5 + $0xd8] sm:$0xff]   ;;  %v1443_v20 = vld [vmem:[#allocation5 + $0x50] sm:$0xff]   ;;  %p1630_p0 = por %p1629_p13, %p1628_p12 }
  0x42   :  { %v1437_v14 = vld [vmem:[#allocation5 + $0x20] sm:$0xff]   ;;  %v1441_v18 = vld [vmem:[#allocation5 + $0x18] sm:$0xff]   ;;  %v1444_v21 = vld [vmem:[#allocation5 + $0xd0] sm:$0xff]  }
  0x43   :  { %1241 = vmatpush3.bf16.msra.mxu0 %v1429_v6  ;;  %v1438_v15 = vld [vmem:[#allocation5 + $0xa0] sm:$0xff]   ;;  %v1442_v19 = vld [vmem:[#allocation5 + $0x98] sm:$0xff]   ;;  %v1445_v22 = vld [vmem:[#allocation5 + $0x10] sm:$0xff]   ;;  %p1631_p1 = pnand %p1630_p0, %p1624_p11 }
  0x44   :  { %1263 = vmatpush3.bf16.msra.mxu1 %v1430_v7  ;;  %1242 = vmatprep.subr.bf16.mxu0 %v1431_v8  ;;  %v1446_v23 = vld [vmem:[#allocation5 + $0x90] sm:$0xff]   ;;  %v1447_v24 = vld [vmem:[#allocation5 + $0x48] sm:$0xff]   ;;  %v1451_v28 = vld [vmem:[#allocation5 + $0x40] sm:$0xff]  }
  0x45   :  { %1264 = vmatprep.subr.bf16.mxu1 %v1432_v9  ;;  %v1448_v25 = vld [vmem:[#allocation5 + $0xc8] sm:$0xff]   ;;  %v1452_v29 = vld [vmem:[#allocation5 + $0xc0] sm:$0xff]   ;;  %v1459_v38 = vld [vmem:[#allocation5 + $0x178] sm:$0xff]  }
  0x46   :  { %v1449_v26 = vld [vmem:[#allocation5 + $0x8] sm:$0xff]   ;;  %v1453_v30 = vld [vmem:[#allocation5] sm:$0xff]   ;;  %v1460_v39 = vld [vmem:[#allocation5 + $0x1f8] sm:$0xff]  }
  0x47   :  { %1243 = vmatpush3.bf16.msra.mxu0 %v1433_v10  ;;  %v1450_v27 = vld [vmem:[#allocation5 + $0x88] sm:$0xff]   ;;  %v1454_v31 = vld [vmem:[#allocation5 + $0x80] sm:$0xff]   ;;  %v1461_v40 = vld [vmem:[#allocation5 + $0x138] sm:$0xff]  }
  0x48   :  { %1265 = vmatpush3.bf16.msra.mxu1 %v1434_v11  ;;  %1244 = vmatprep.subr.bf16.mxu0 %v1435_v12  ;;  %v88_v32 = vld [vmem:[#allocation2] sm:$0xff]  ;;  %v89_v33 = vld [vmem:[#allocation2 + $0x8] sm:$0xff]  ;;  %v1462_v41 = vld [vmem:[#allocation5 + $0x1b8] sm:$0xff]  }
  0x49   :  { %1266 = vmatprep.subr.bf16.mxu1 %v1436_v13  ;;  %v1142_v34 = vcombine.low %v88_v32, %v88_v32  ;;  %v1143_v35 = vcombine.high %v88_v32, %v88_v32  ;;  %v1144_v36 = vcombine.low %v89_v33, %v89_v33  ;;  %v1145_v37 = vcombine.high %v89_v33, %v89_v33  ;;  %v1463_v42 = vld [vmem:[#allocation5 + $0x170] sm:$0xff]   ;;  %v1467_v46 = vld [vmem:[#allocation5 + $0x168] sm:$0xff]   ;;  %v1471_v50 = vld [vmem:[#allocation5 + $0x160] sm:$0xff]  }
  0x4a   :  { %v1464_v43 = vld [vmem:[#allocation5 + $0x1f0] sm:$0xff]   ;;  %v1468_v47 = vld [vmem:[#allocation5 + $0x1e8] sm:$0xff]   ;;  %v1472_v51 = vld [vmem:[#allocation5 + $0x1e0] sm:$0xff]   ;;  %v1658_v13 = vmov 0.0  }
  0x4b   :  { %1245 = vmatpush3.bf16.msra.mxu0 %v1437_v14  ;;  %664 = vmatprep.mubr.bf16.mxu0 %v1143_v35  ;;  %v1465_v44 = vld [vmem:[#allocation5 + $0x130] sm:$0xff]   ;;  %v1469_v48 = vld [vmem:[#allocation5 + $0x128] sm:$0xff]   ;;  %v1473_v52 = vld [vmem:[#allocation5 + $0x120] sm:$0xff]  }
  0x4c   :  { %1267 = vmatpush3.bf16.msra.mxu1 %v1438_v15  ;;  %1246 = vmatprep.subr.bf16.mxu0 %v1439_v16  ;;  %v1466_v45 = vld [vmem:[#allocation5 + $0x1b0] sm:$0xff]   ;;  %v1470_v49 = vld [vmem:[#allocation5 + $0x1a8] sm:$0xff]   ;;  %v1474_v53 = vld [vmem:[#allocation5 + $0x1a0] sm:$0xff]  }
  0x4d   :  { %1268 = vmatprep.subr.bf16.mxu1 %v1440_v17  ;;  %704 = vmatprep.mubr.bf16.mxu1 %v1145_v37  ;;  %v1475_v54 = vld [vmem:[#allocation5 + $0x158] sm:$0xff]   ;;  %v1479_v58 = vld [vmem:[#allocation5 + $0x150] sm:$0xff]   ;;  %v1483_v62 = vld [vmem:[#allocation5 + $0x148] sm:$0xff]  }
  0x4e   :  { %v1476_v55 = vld [vmem:[#allocation5 + $0x1d8] sm:$0xff]   ;;  %v1480_v59 = vld [vmem:[#allocation5 + $0x1d0] sm:$0xff]   ;;  %v1484_v63 = vld [vmem:[#allocation5 + $0x1c8] sm:$0xff]  }
  0x4f   :  { %1247 = vmatpush3.bf16.msra.mxu0 %v1441_v18  ;;  %v1477_v56 = vld [vmem:[#allocation5 + $0x118] sm:$0xff]   ;;  %v1481_v60 = vld [vmem:[#allocation5 + $0x110] sm:$0xff]   ;;  %v1485_v0 = vld [vmem:[#allocation5 + $0x108] sm:$0xff]  }
  0x50   :  { %1269 = vmatpush3.bf16.msra.mxu1 %v1442_v19  ;;  %1248 = vmatprep.subr.bf16.mxu0 %v1443_v20  ;;  %v1478_v57 = vld [vmem:[#allocation5 + $0x198] sm:$0xff]   ;;  %v1482_v61 = vld [vmem:[#allocation5 + $0x190] sm:$0xff]   ;;  %v1486_v1 = vld [vmem:[#allocation5 + $0x188] sm:$0xff]  }
  0x51   :  { %1270 = vmatprep.subr.bf16.mxu1 %v1444_v21  ;;  %v1487_v2 = vld [vmem:[#allocation5 + $0x140] sm:$0xff]   ;;  %v90_v6 = vld [vmem:[#allocation2 + $0x10] sm:$0xff]  ;;  %v91_v9 = vld [vmem:[#allocation2 + $0x18] sm:$0xff] }
  0x52   :  { %v1488_v3 = vld [vmem:[#allocation5 + $0x1c0] sm:$0xff]   ;;  %v1146_v7 = vcombine.low %v90_v6, %v90_v6  ;;  %v1147_v8 = vcombine.high %v90_v6, %v90_v6  ;;  %v1148_v10 = vcombine.low %v91_v9, %v91_v9  ;;  %v1149_v11 = vcombine.high %v91_v9, %v91_v9  ;;  %v1495_v12 = vld [vmem:[#allocation7 + $0x38] sm:$0xff]   ;;  %v1496_v14 = vld [vmem:[#allocation7 + $0x30] sm:$0xff]  }
  0x53   :  { %1249 = vmatpush3.bf16.msra.mxu0 %v1445_v22  ;;  %v1489_v4 = vld [vmem:[#allocation5 + $0x100] sm:$0xff]   ;;  %v1497_v15 = vld [vmem:[#allocation7 + $0x28] sm:$0xff]   ;;  %v1499_v17 = vld [vmem:[#allocation7 + $0x18] sm:$0xff]  }
  0x54   :  { %1271 = vmatpush3.bf16.msra.mxu1 %v1446_v23  ;;  %1250 = vmatprep.subr.bf16.mxu0 %v1447_v24  ;;  %v1490_v5 = vld [vmem:[#allocation5 + $0x180] sm:$0xff]   ;;  %v1500_v18 = vld [vmem:[#allocation7 + $0x10] sm:$0xff]   ;;  %v1501_v19 = vld [vmem:[#allocation7 + $0x8] sm:$0xff]  }
  0x55   :  { %1272 = vmatprep.subr.bf16.mxu1 %v1448_v25  ;;  %v1498_v16 = vld [vmem:[#allocation7 + $0x20] sm:$0xff]   ;;  %v1503_v21 = vld [vmem:[#allocation8 + $0x38] sm:$0xff]   ;;  %v1504_v22 = vld [vmem:[#allocation8 + $0x30] sm:$0xff]  }
  0x56   :  { %v1502_v20 = vld [vmem:[#allocation7] sm:$0xff]   ;;  %v1505_v23 = vld [vmem:[#allocation8 + $0x28] sm:$0xff]   ;;  %v1507_v25 = vld [vmem:[#allocation8 + $0x18] sm:$0xff]  }
  0x57   :  { %1251 = vmatpush3.bf16.msra.mxu0 %v1449_v26  ;;  %v1506_v24 = vld [vmem:[#allocation8 + $0x20] sm:$0xff]   ;;  %v1508_v26 = vld [vmem:[#allocation8 + $0x10] sm:$0xff]  }
  0x58   :  { %1273 = vmatpush3.bf16.msra.mxu1 %v1450_v27  ;;  %1252 = vmatprep.subr.bf16.mxu0 %v1451_v28  ;;  %v1509_v27 = vld [vmem:[#allocation8 + $0x8] sm:$0xff]  }
  0x59   :  { %1274 = vmatprep.subr.bf16.mxu1 %v1452_v29 }
  0x5b   :  { %1253 = vmatpush3.bf16.msra.mxu0 %v1453_v30 }
  0x5c   :  { %1275 = vmatpush3.bf16.msra.mxu1 %v1454_v31  ;;  %1282 = vmatprep.subr.bf16.mxu0 %v1459_v38 }
  0x5d   :  { %1304 = vmatprep.subr.bf16.mxu1 %v1460_v39 }
  0x5e   :  { %665 = vmatmul.mubr.bf16.vlgmr.msra.gmra.mxu0 %v1142_v34 }
  0x5f   :  { %705 = vmatmul.mubr.bf16.vlgmr.msra.gmra.mxu1 %v1144_v36  ;;  %1283 = vmatpush3.bf16.msra.mxu0 %v1461_v40 }
  0x60   :  { %1305 = vmatpush3.bf16.msra.mxu1 %v1462_v41  ;;  %1284 = vmatprep.subr.bf16.mxu0 %v1463_v42 }
  0x61   :  { %1306 = vmatprep.subr.bf16.mxu1 %v1464_v43  ;;  %744 = vmatprep.mubr.bf16.mxu0 %v1147_v8 }
  0x62   :  { %784 = vmatprep.mubr.bf16.mxu1 %v1149_v11 }
  0x63   :  { %1285 = vmatpush3.bf16.msra.mxu0 %v1465_v44 }
  0x64   :  { %1307 = vmatpush3.bf16.msra.mxu1 %v1466_v45  ;;  %1286 = vmatprep.subr.bf16.mxu0 %v1467_v46 }
  0x65   :  { %1308 = vmatprep.subr.bf16.mxu1 %v1468_v47 }
  0x67   :  { %1287 = vmatpush3.bf16.msra.mxu0 %v1469_v48 }
  0x68   :  { %1309 = vmatpush3.bf16.msra.mxu1 %v1470_v49  ;;  %1288 = vmatprep.subr.bf16.mxu0 %v1471_v50 }
  0x69   :  { %1310 = vmatprep.subr.bf16.mxu1 %v1472_v51 }
  0x6b   :  { %1289 = vmatpush3.bf16.msra.mxu0 %v1473_v52 }
  0x6c   :  { %1311 = vmatpush3.bf16.msra.mxu1 %v1474_v53  ;;  %1290 = vmatprep.subr.bf16.mxu0 %v1475_v54  ;;  %v1510_v53 = vld [vmem:[#allocation8] sm:$0xff]   ;;  %v1511_v54 = vld [vmem:[#allocation10 + $0x38] sm:$0xff]  }
  0x6d   :  { %1312 = vmatprep.subr.bf16.mxu1 %v1476_v55  ;;  %v1512_v55 = vld [vmem:[#allocation10 + $0x30] sm:$0xff]  }
  0x6f   :  { %1291 = vmatpush3.bf16.msra.mxu0 %v1477_v56  ;;  %v1513_v56 = vld [vmem:[#allocation10 + $0x28] sm:$0xff]  }
  0x70   :  { %1313 = vmatpush3.bf16.msra.mxu1 %v1478_v57  ;;  %1292 = vmatprep.subr.bf16.mxu0 %v1479_v58  ;;  %v1514_v57 = vld [vmem:[#allocation10 + $0x20] sm:$0xff]   ;;  %v1515_v58 = vld [vmem:[#allocation10 + $0x18] sm:$0xff]  }
  0x71   :  { %1314 = vmatprep.subr.bf16.mxu1 %v1480_v59  ;;  %v1516_v59 = vld [vmem:[#allocation10 + $0x10] sm:$0xff]  }
  0x73   :  { %1293 = vmatpush3.bf16.msra.mxu0 %v1481_v60  ;;  %v1517_v60 = vld [vmem:[#allocation10 + $0x8] sm:$0xff]  }
  0x74   :  { %1315 = vmatpush3.bf16.msra.mxu1 %v1482_v61  ;;  %1294 = vmatprep.subr.bf16.mxu0 %v1483_v62 }
  0x75   :  { %1316 = vmatprep.subr.bf16.mxu1 %v1484_v63 }
  0x77   :  { %1295 = vmatpush3.bf16.msra.mxu0 %v1485_v0 }
  0x78   :  { %1317 = vmatpush3.bf16.msra.mxu1 %v1486_v1  ;;  %1296 = vmatprep.subr.bf16.mxu0 %v1487_v2 }
  0x79   :  { %1318 = vmatprep.subr.bf16.mxu1 %v1488_v3  ;;  %v1518_v3 = vld [vmem:[#allocation10] sm:$0xff]  }
  0x7b   :  { %1297 = vmatpush3.bf16.msra.mxu0 %v1489_v4 }
  0x7c   :  { %1319 = vmatpush3.bf16.msra.mxu1 %v1490_v5  ;;  %1353 = vmatprep.subr.bf16.mxu0 %v1658_v13 }
  0x7d   :  { %1373 = vmatprep.subr.bf16.mxu1 %v1658_v13 }
  0x7e   :  { %745 = vmatmul.mubr.bf16.vlgmr.msra.gmra.mxu0 %v1146_v7 }
  0x7f   :  { %785 = vmatmul.mubr.bf16.vlgmr.msra.gmra.mxu1 %v1148_v10  ;;  %1354 = vmatpush3.bf16.msra.mxu0 %v1495_v12  ;;  %v1110_v10 = vlaneseq }
  0x80   :  { %1355 = vmatprep.subr.bf16.mxu0 %v1658_v13  ;;  %1369 = vmatprep.mubr.msk.bf16.mxu0 %vm1659_vm0, %v1658_v13 }
  0x81   :  { %1389 = vmatprep.mubr.msk.bf16.mxu1 %vm1659_vm0, %v1658_v13  ;;  %1374 = vmatpush3.bf16.msra.mxu1 %v1503_v21  ;;  %v1111_v11 = vand.u32 127, %v1110_v10 }
  0x82   :  { %1375 = vmatprep.subr.bf16.mxu1 %v1658_v13 }
  0x83   :  { %1356 = vmatpush3.bf16.msra.mxu0 %v1496_v14  ;;  %vm1112_vm1 = vcmp.lt.s32.totalorder %v1111_v11, 10 }
  0x84   :  { %1357 = vmatprep.subr.bf16.mxu0 %v1658_v13 }
  0x85   :  { %1376 = vmatpush3.bf16.msra.mxu1 %v1504_v22 }
  0x86   :  { %1377 = vmatprep.subr.bf16.mxu1 %v1658_v13 }
  0x87   :  { %1358 = vmatpush3.bf16.msra.mxu0 %v1497_v15 }
  0x88   :  { %1359 = vmatprep.subr.bf16.mxu0 %v1658_v13 }
  0x89   :  { %1378 = vmatpush3.bf16.msra.mxu1 %v1505_v23 }
  0x8a   :  { %1379 = vmatprep.subr.bf16.mxu1 %v1658_v13 }
  0x8b   :  { %1360 = vmatpush3.bf16.msra.mxu0 %v1498_v16 }
  0x8c   :  { %1361 = vmatprep.subr.bf16.mxu0 %v1658_v13 }
  0x8d   :  { %1380 = vmatpush3.bf16.msra.mxu1 %v1506_v24 }
  0x8e   :  { %1381 = vmatprep.subr.bf16.mxu1 %v1658_v13 }
  0x8f   :  { %1362 = vmatpush3.bf16.msra.mxu0 %v1499_v17 }
  0x90   :  { %1363 = vmatprep.subr.bf16.mxu0 %v1658_v13 }
  0x91   :  { %1382 = vmatpush3.bf16.msra.mxu1 %v1507_v25 }
  0x92   :  { %1383 = vmatprep.subr.bf16.mxu1 %v1658_v13 }
  0x93   :  { %1364 = vmatpush3.bf16.msra.mxu0 %v1500_v18 }
  0x94   :  { %1365 = vmatprep.subr.bf16.mxu0 %v1658_v13 }
  0x95   :  { %1384 = vmatpush3.bf16.msra.mxu1 %v1508_v26 }
  0x96   :  { %1385 = vmatprep.subr.bf16.mxu1 %v1658_v13 }
  0x97   :  { %1366 = vmatpush3.bf16.msra.mxu0 %v1501_v19 }
  0x98   :  { %1367 = vmatprep.subr.bf16.mxu0 %v1658_v13 }
  0x99   :  { %1386 = vmatpush3.bf16.msra.mxu1 %v1509_v27 }
  0x9a   :  { %1387 = vmatprep.subr.bf16.mxu1 %v1658_v13 }
  0x9b   :  { %1368 = vmatpush3.bf16.msra.mxu0 %v1502_v20 }
  0x9c   :  { %1393 = vmatprep.subr.bf16.mxu0 %v1658_v13 }
  0x9d   :  { %1388 = vmatpush3.bf16.msra.mxu1 %v1510_v53 }
 0x11e   :  { %v1254_v28 = vpop.f32.mrf.mxu0 }
 0x11f   :  { %v1276_v29 = vpop.f32.mrf.mxu1 }
 0x120   :  { %v1255_v30 = vpop.f32.mrf.mxu0 }
 0x121   :  { %v1277_v31 = vpop.f32.mrf.mxu1  ;;  %v1256_v36 = vadd.f32 %v1255_v30, %v1254_v28 }
 0x122   :  { %v1257_v32 = vpop.f32.mrf.mxu0  ;;  %v1278_v37 = vadd.f32 %v1277_v31, %v1276_v29 }
 0x123   :  { %v1279_v33 = vpop.f32.mrf.mxu1 }
 0x124   :  { %v1258_v34 = vpop.f32.mrf.mxu0  ;;  %v707_v42 = vadd.f32 %v1278_v37, %v1256_v36 }
 0x125   :  { %v1280_v35 = vpop.f32.mrf.mxu1 }
 0x13e   :  { %v1298_v38 = vpop.f32.mrf.mxu0 }
 0x13f   :  { %v1320_v39 = vpop.f32.mrf.mxu1 }
 0x140   :  { %v1299_v40 = vpop.f32.mrf.mxu0 }
 0x141   :  { %v1321_v41 = vpop.f32.mrf.mxu1  ;;  %v1300_v43 = vadd.f32 %v1299_v40, %v1298_v38 }
 0x142   :  { %v1301_v44 = vpop.f32.mrf.mxu0  ;;  %v1322_v47 = vadd.f32 %v1321_v41, %v1320_v39 }
 0x143   :  { %v1323_v45 = vpop.f32.mrf.mxu1  ;;  %v747_v46 = vadd.f32 %v1300_v43, %v707_v42 }
 0x144   :  { %v1302_v48 = vpop.f32.mrf.mxu0 }
 0x145   :  { %v1324_v49 = vpop.f32.mrf.mxu1  ;;  %v787_v50 = vadd.f32 %v1322_v47, %v747_v46 }
 0x147   :  { %v792_v51 = vmax.f32 %v787_v50, 0.0 }
 0x149   :  { %v793_v52 = vpack.c.bf16 %v792_v51, %v792_v51 }
 0x14b   :  { %1370 = vmatmul.mubr.bf16.vlgmr.msra.gmra.mxu0 %v793_v52 }
 0x14c   :  { %1409 = vmatprep.mubr.msk.bf16.mxu0 %vm1659_vm0, %v1658_v13  ;;  %1394 = vmatpush3.bf16.msra.mxu0 %v1511_v54 }
 0x14d   :  { %1395 = vmatprep.subr.bf16.mxu0 %v1658_v13 }
 0x150   :  { %1396 = vmatpush3.bf16.msra.mxu0 %v1512_v55 }
 0x151   :  { %1397 = vmatprep.subr.bf16.mxu0 %v1658_v13 }
 0x154   :  { %1398 = vmatpush3.bf16.msra.mxu0 %v1513_v56 }
 0x155   :  { %1399 = vmatprep.subr.bf16.mxu0 %v1658_v13 }
 0x158   :  { %1400 = vmatpush3.bf16.msra.mxu0 %v1514_v57 }
 0x159   :  { %1401 = vmatprep.subr.bf16.mxu0 %v1658_v13 }
 0x15c   :  { %1402 = vmatpush3.bf16.msra.mxu0 %v1515_v58 }
 0x15d   :  { %1403 = vmatprep.subr.bf16.mxu0 %v1658_v13 }
 0x160   :  { %1404 = vmatpush3.bf16.msra.mxu0 %v1516_v59 }
 0x161   :  { %1405 = vmatprep.subr.bf16.mxu0 %v1658_v13 }
 0x164   :  { %1406 = vmatpush3.bf16.msra.mxu0 %v1517_v60 }
 0x165   :  { %1407 = vmatprep.subr.bf16.mxu0 %v1658_v13 }
 0x168   :  { %1408 = vmatpush3.bf16.msra.mxu0 %v1518_v3 }
 0x20b   :  { %v892_v61 = vpop.f32.mrf.mxu0 }
 0x20c   :  { %v898_v62 = vmax.f32 %v892_v61, 0.0 }
 0x20d   :  { %v1371_v63 = vpop.f32.mrf.mxu0 }
 0x20e   :  { %v899_v0 = vpack.c.bf16 %v898_v62, %v898_v62 }
 0x20f   :  { %v895_v1 = vpop.f32.mrf.mxu0 }
 0x210   :  { %1390 = vmatmul.mubr.bf16.vlgmr.msra.gmra.mxu1 %v899_v0 }
 0x211   :  { %v1372_v2 = vpop.f32.mrf.mxu0 }
 0x2d0   :  { %v998_v4 = vpop.f32.mrf.mxu1 }
 0x2d1   :  { %v1004_v5 = vmax.f32 %v998_v4, 0.0 }
 0x2d2   :  { %v1391_v6 = vpop.f32.mrf.mxu1 }
 0x2d3   :  { %v1005_v7 = vpack.c.bf16 %v1004_v5, %v1004_v5 }
 0x2d4   :  { %v1001_v8 = vpop.f32.mrf.mxu1 }
 0x2d5   :  { %1410 = vmatmul.mubr.bf16.vlgmr.msra.gmra.mxu0 %v1005_v7 }
 0x2d6   :  { %v1392_v9 = vpop.f32.mrf.mxu1 }
 0x395   :  { %v1104_v12 = vpop.f32.mrf.mxu0 }
 0x396   :  { %v1113_v13 = vsel %vm1112_vm1, %v1104_v12, -1e+30 }
 0x397   :  { %1114 = vmax.xlane.f32.xlu0 %v1113_v13  ;;  %v1411_v14 = vpop.f32.mrf.mxu0 }
 0x399   :  { %v1107_v15 = vpop.f32.mrf.mxu0 }
 0x39b   :  { %v1412_v16 = vpop.f32.mrf.mxu0 }
 0x420   :  { %v1115_v17 = vpop.xlane.xlu0 %1114 }
 0x421   :  { %v1116_v18 = vsub.f32 %v1113_v13, %v1115_v17 }
 0x423   :  { %v1117_v19 = vmul.f32 1.442695, %v1116_v18 }
 0x425   :  { %1519 = vpow2.f32 %v1117_v19 }
 0x432   :  { %v1520_v20 = vpop.eup %1519 }
 0x433   :  { %1119 = vadd.xlane.f32.xlu0 %v1520_v20 }
 0x4bc   :  { %v1120_v21 = vpop.xlane.xlu0 %1119 }
 0x4bd   :  { %1521 = vlog2.f32 %v1120_v21 }
 0x4ca   :  { %v1522_v22 = vpop.eup %1521 }
 0x4cb   :  { %v1122_v23 = vmul.f32 0.6931472, %v1522_v22 }
 0x4cd   :  { %v1123_v24 = vsub.f32 %v1116_v18, %v1122_v23 }
 0x4cf   :  { %1124 = vst [vmem:[#allocation11] sm:$0xff] %v1123_v24 }
 0x4d0   :  { %1634 = shalt.err (!%p1631_p1)
}
 0x4d1   :  { %1134 = dma.vmem_to_hbm [thread:$0]  %s1132_s4, 128, %s1756_s5, [#allocation4]  }
 0x4d2   :  { %1649 = dma.done.wait [#allocation4], 128  }
 0x4d3   :  { %1650 = vsyncadd [#allocation4], 4294967168 }
 0x4d4   :  { %1138 = vsyncpa [#allocation3], 1 }
 0x4d5   :  { %1139 = vsyncpa [#allocation6], 1 }
 0x4d6   :  { %1140 = vsyncpa [#allocation9], 1 }
 0x4d7   :  { %1141 = vsyncpa [#allocation4], 1 }

</bundles_post_ra>
